<compile_context>
chip_gen: v7x
topology: tpu7x:2x2x1
jax: 0.10.0
libtpu: 0.0.40
codegen_flags: <defaults>
</compile_context>

<pallas_src>
import functools

import numpy as np
import jax
import jax.numpy as jnp
from jax import lax
from jax.experimental import pallas as pl
from jax.experimental.pallas import tpu as pltpu

_TWO_PI = 2.0 * np.pi
_LANE = 128


def _harmonic_osc_kernel(f0_ref, amp_ref, tri_ref, ph0_ref,
                         sig_ref, fph_ref, carry_ref, *,
                         fs, remove_above_nyquist):
    t = pl.program_id(1)

    # Reset the running-phase carry at the first time block of every batch row.
    @pl.when(t == 0)
    def _init():
        carry_ref[...] = ph0_ref[0]                        # (1, 1)

    tc = f0_ref.shape[2]
    n_harm = amp_ref.shape[2]
    nc = tc // _LANE

    f0 = f0_ref[0]                                         # (1, Tc), time on lanes
    omega = (_TWO_PI / fs) * f0                            # (1, Tc)
    tri = tri_ref[...]                                     # (128, 128) upper-tri

    # Harmonic numbers as a tiny (H, 1) column; broadcast inside the multiplies
    # instead of materializing an (H, Tc) iota (+add+cast) every grid step.
    harm = (lax.broadcasted_iota(jnp.int32, (n_harm, 1), 0) + 1).astype(jnp.float32)
    half_fs = 0.5 * fs

    # Wrapped fundamental phase entering the current 128-lane chunk.
    base = carry_ref[...]                                  # (1, 1)

    # Static loop over 128-lane chunks: O(Tc) cumsum via a fixed 128x128 tri
    # matmul (MXU), small aligned (128,H)->(H,128) XLU transpose of the amp
    # slab, lane-dense sin bank + harmonic reduction + unmasked store.
    for c in range(nc):
        lo, hi = c * _LANE, (c + 1) * _LANE
        om_c = omega[:, lo:hi]                             # (1, 128)
        f0_c = f0[:, lo:hi]                                # (1, 128)

        # Inclusive prefix sum over the chunk (time on lanes) on the MXU.
        cs_c = jnp.dot(om_c, tri, preferred_element_type=jnp.float32)   # (1, 128)

        # Per-sample mod-2*pi wrap: exact for integer harmonics, keeps sin
        # arguments <= 2*pi*H regardless of block size / sequence length.
        phase_c = jnp.mod(cs_c + base, _TWO_PI)            # (1, 128)
        base = phase_c[:, _LANE - 1:_LANE]                 # (1, 1) carry (wrapped)

        # Amplitudes straight from the untransposed (B, T, H) input; transpose
        # the small lane-aligned tile in-kernel (XLU has slack).
        a_c = amp_ref[0, lo:hi, :].astype(jnp.float32)     # (128, H)
        a_t = jnp.transpose(a_c)                           # (H, 128)

        if remove_above_nyquist:
            # Same formulation as the reference (gain 1+1e-4 below Nyquist);
            # the f0*harm comparison is bit-identical to the pure-JAX ref.
            aa = (f0_c * harm < half_fs).astype(jnp.float32) + 1e-4     # (H, 128)
            a_t = a_t * aa

        phases = phase_c * harm                            # (H, 128)
        sig_c = jnp.sum(jnp.sin(phases) * a_t, axis=0, keepdims=True)   # (1, 128)

        mask_c = (f0_c > 0.0).astype(jnp.float32)
        sig_ref[0, :, lo:hi] = sig_c * mask_c              # full-lane store

    # Carry the wrapped running phase to the next time block.
    carry_ref[...] = base

    # Final phase: only the last time block of each batch row writes it.
    @pl.when(t == pl.num_programs(1) - 1)
    def _finalize():
        fph_ref[0] = base                                  # (1, 1)


def harmonic_oscillator(f0, amplitudes, initial_phase=None, *, fs,
                        is_remove_above_nyquist=True, time_block=512):
    """Pallas TPU implementation of HarmonicOscillator.forward.

      f0:            (B, T, 1) Hz
      amplitudes:    (B, T, H)   (f32 or bf16; bf16 halves the dominant HBM stream)
      initial_phase: (B, 1, 1) or None
    returns (signal (B, T), final_phase (B, 1, 1))
    """
    B, T, _ = f0.shape
    H = amplitudes.shape[-1]

    tc = int(time_block)
    assert tc > 0 and tc % _LANE == 0, "time_block must be a positive multiple of 128"
    # Don't use a block (much) larger than the sequence itself.
    tc = max(_LANE, min(tc, pl.cdiv(T, _LANE) * _LANE))

    if initial_phase is None:
        initial_phase = jnp.zeros((B, 1, 1), dtype=jnp.float32)

    f0 = f0.astype(jnp.float32)
    initial_phase = initial_phase.astype(jnp.float32)
    # Amplitudes are read untouched from HBM (no transpose/pad copy). bf16
    # transport is supported; upcast happens in-kernel after load.
    if amplitudes.dtype != jnp.bfloat16:
        amplitudes = amplitudes.astype(jnp.float32)

    num_t = pl.cdiv(T, tc)
    t_pad = num_t * tc

    # f0 is tiny (1/H of the amplitude traffic): squeeze + zero-pad it once so
    # the in-kernel phase math is lane-dense with no extra relayout.
    f0_t = jnp.pad(f0[..., 0], ((0, 0), (0, t_pad - T)))[:, None, :]     # (B,1,t_pad)

    # Fixed 128x128 upper-triangular constant for the chunked cumsum (64 KiB;
    # constant index_map keeps it resident -- small enough that the default
    # double-buffering is irrelevant even on v7x).
    tri = jnp.asarray(np.triu(np.ones((_LANE, _LANE), dtype=np.float32)))

    kernel = functools.partial(
        _harmonic_osc_kernel, fs=float(fs),
        remove_above_nyquist=bool(is_remove_above_nyquist))

    grid = (B, num_t)
    grid_spec = pltpu.PrefetchScalarGridSpec(
        num_scalar_prefetch=0,
        grid=grid,
        in_specs=[
            pl.BlockSpec((1, 1, tc), lambda b, t: (b, 0, t)),        # f0 (B,1,t_pad)
            pl.BlockSpec((1, tc, H), lambda b, t: (b, t, 0)),        # amplitudes (B,T,H)
            pl.BlockSpec((_LANE, _LANE), lambda b, t: (0, 0)),       # tri (resident)
            pl.BlockSpec((1, 1, 1), lambda b, t: (b, 0, 0)),         # initial phase
        ],
        out_specs=(
            pl.BlockSpec((1, 1, tc), lambda b, t: (b, 0, t)),        # signal (lane-dense)
            pl.BlockSpec((1, 1, 1), lambda b, t: (b, 0, 0)),         # final phase
        ),
        scratch_shapes=[pltpu.VMEM((1, 1), jnp.float32)],            # running-phase carry
    )

    signal_pad, final_phase = pl.pallas_call(
        kernel,
        out_shape=(jax.ShapeDtypeStruct((B, 1, t_pad), jnp.float32),
                   jax.ShapeDtypeStruct((B, 1, 1), jnp.float32)),
        grid_spec=grid_spec,
        compiler_params=pltpu.CompilerParams(
            dimension_semantics=("parallel", "arbitrary")),
    )(f0_t, amplitudes, tri, initial_phase)

    return signal_pad[:, 0, :T], final_phase


def _reference(f0, amplitudes, initial_phase, fs):
    """Pure-JAX reference mirroring the PyTorch semantics."""
    H = amplitudes.shape[-1]
    mask = (f0 > 0).astype(f0.dtype)
    phase = jnp.cumsum(2.0 * np.pi * f0 / fs, axis=1) + initial_phase
    harm = jnp.arange(1, H + 1, dtype=f0.dtype)
    phases = phase * harm
    aa = (f0 * harm < fs / 2.0).astype(f0.dtype) + 1e-4
    amp = amplitudes * aa
    signal = (jnp.sin(phases) * amp).sum(-1, keepdims=True)
    signal = (signal * mask)[..., 0]
    final_phase = jnp.mod(phase[:, -1:, :], 2.0 * np.pi)
    return signal, final_phase


if __name__ == "__main__":
    fs = 8000

    def run_case(B, T, H, rtol, atol, f0_lo, f0_hi, time_block=512):
        key = jax.random.PRNGKey(0)
        k1, k2, k3 = jax.random.split(key, 3)
        # f0 includes non-positive values (exercises the mask) and values whose
        # upper harmonics exceed Nyquist (exercises remove_above_nyquist).
        f0 = jax.random.uniform(k1, (B, T, 1), minval=f0_lo, maxval=f0_hi,
                                dtype=jnp.float32)
        amplitudes = jax.random.uniform(k2, (B, T, H), dtype=jnp.float32)
        initial_phase = jax.random.uniform(k3, (B, 1, 1), minval=0.0,
                                           maxval=2.0 * np.pi, dtype=jnp.float32)

        sig, fph = harmonic_oscillator(f0, amplitudes, initial_phase, fs=fs,
                                       time_block=time_block)
        jax.block_until_ready((sig, fph))

        ref_sig, ref_fph = _reference(f0, amplitudes, initial_phase, float(fs))
        np.testing.assert_allclose(np.asarray(sig), np.asarray(ref_sig),
                                   rtol=rtol, atol=atol)
        # Compare final phases on the circle (robust to mod-2*pi boundary).
        dphi = np.mod(np.asarray(fph) - np.asarray(ref_fph) + np.pi,
                      2.0 * np.pi) - np.pi
        np.testing.assert_allclose(dphi, np.zeros_like(dphi), rtol=0, atol=atol)

    # Single time block (T rounded to 128): masking + Nyquist removal + padding.
    run_case(B=2, T=64, H=8, rtol=5e-4, atol=5e-4, f0_lo=-200.0, f0_hi=2000.0)
    # Forced time_block=128 -> two time blocks: exercises the carried running
    # phase, the pl.when-gated final-phase write and the amp boundary block.
    run_case(B=2, T=200, H=10, rtol=2e-3, atol=2e-3, f0_lo=-200.0, f0_hi=2000.0,
             time_block=128)
    # Default Tc=512, two time blocks, B=1: multi-chunk in-block cumsum plus the
    # cross-block carry.  Tolerance is dominated by the pure-f32 reference,
    # which feeds *unwrapped* phase*harmonic (thousands of radians) into sin;
    # the kernel wraps mod 2*pi and is the more accurate side.
    run_case(B=1, T=700, H=12, rtol=5e-3, atol=5e-3, f0_lo=-100.0, f0_hi=800.0)

    print("KERNEL_OK")
</pallas_src>

<mosaic_0001>
module attributes {stable_mosaic.version = 11 : i64} {
  func.func @_harmonic_osc_kernel(%arg0: i32, %arg1: i32, %arg2: memref<1x1x128xf32, #tpu.memory_space<vmem>>, %arg3: memref<1x128x8xf32, #tpu.memory_space<vmem>>, %arg4: memref<128x128xf32, #tpu.memory_space<vmem>>, %arg5: memref<1x1x1xf32, #tpu.memory_space<vmem>>, %arg6: memref<1x1x128xf32, #tpu.memory_space<vmem>>, %arg7: memref<1x1x1xf32, #tpu.memory_space<vmem>>, %arg8: memref<1x1xf32, #tpu.memory_space<vmem>>) attributes {dimension_semantics = [#tpu.dimension_semantics<parallel>, #tpu.dimension_semantics<arbitrary>], iteration_bounds = array<i64: 2, 1>, scalar_prefetch = 0 : i64, scratch_operands = 1 : i64, tpu.core_type = #tpu.core_type<tc>, window_params = [{transform_indices = @transform_0, window_bounds = array<i64: 1, 1, 128>}, {transform_indices = @transform_1, window_bounds = array<i64: 1, 128, 8>}, {pipeline_mode = #tpu.pipeline_mode<synchronous>, transform_indices = @transform_2, window_bounds = array<i64: 128, 128>}, {transform_indices = @transform_3, window_bounds = array<i64: 1, 1, 1>}, {transform_indices = @transform_4, window_bounds = array<i64: 1, 1, 128>}, {transform_indices = @transform_5, window_bounds = array<i64: 1, 1, 1>}]} {
    %c0_i32 = arith.constant 0 : i32
    %0 = arith.cmpi eq, %arg1, %c0_i32 : i32
    %1 = arith.extui %0 : i1 to i32
    %c0_i32_0 = arith.constant 0 : i32
    %2 = arith.cmpi ne, %1, %c0_i32_0 : i32
    scf.if %2 {
      %c0_26 = arith.constant 0 : index
      %c0_27 = arith.constant 0 : index
      %c0_28 = arith.constant 0 : index
      %63 = vector.load %arg5[%c0_26, %c0_27, %c0_28] : memref<1x1x1xf32, #tpu.memory_space<vmem>>, vector<1x1x1xf32>
      %64 = vector.shape_cast %63 : vector<1x1x1xf32> to vector<1x1xf32>
      %c0_29 = arith.constant 0 : index
      %c0_30 = arith.constant 0 : index
      %65 = vector.load %arg8[%c0_29, %c0_30] : memref<1x1xf32, #tpu.memory_space<vmem>>, vector<1x1xf32>
      tpu.vector_store %arg8[%c0_29, %c0_30], %64 {strides = array<i32>} : memref<1x1xf32, #tpu.memory_space<vmem>>, vector<1x1xf32>,
    } else {
    }
    %c0 = arith.constant 0 : index
    %c0_1 = arith.constant 0 : index
    %c0_2 = arith.constant 0 : index
    %3 = vector.load %arg2[%c0, %c0_1, %c0_2] : memref<1x1x128xf32, #tpu.memory_space<vmem>>, vector<1x1x128xf32>
    %4 = vector.shape_cast %3 : vector<1x1x128xf32> to vector<1x128xf32>
    %cst = arith.constant 7.8539818E-4 : f32
    %5 = vector.broadcast %cst : f32 to vector<1x128xf32>
    %6 = arith.mulf %5, %4 : vector<1x128xf32>
    %c0_3 = arith.constant 0 : index
    %c0_4 = arith.constant 0 : index
    %7 = vector.load %arg4[%c0_3, %c0_4] : memref<128x128xf32, #tpu.memory_space<vmem>>, vector<128x128xf32>
    %8 = tpu.iota {dimensions = array<i32: 0>} : vector<8x1xi32>
    %c1_i32 = arith.constant 1 : i32
    %9 = vector.broadcast %c1_i32 : i32 to vector<8x1xi32>
    %10 = arith.addi %8, %9 : vector<8x1xi32>
    %11 = arith.sitofp %10 : vector<8x1xi32> to vector<8x1xf32>
    %c0_5 = arith.constant 0 : index
    %c0_6 = arith.constant 0 : index
    %12 = vector.load %arg8[%c0_5, %c0_6] : memref<1x1xf32, #tpu.memory_space<vmem>>, vector<1x1xf32>
    %cst_7 = arith.constant dense<0.000000e+00> : vector<1x128xf32>
    %13 = tpu.matmul %6, %7, %cst_7 {dimension_numbers = #tpu.dot_dimension_numbers<[1], [0], [0], [1], [0, 0, 1, 1], [], []>} : vector<1x128xf32>, vector<128x128xf32>, vector<1x128xf32> -> vector<1x128xf32>
    %14 = vector.broadcast %12 : vector<1x1xf32> to vector<1x128xf32>
    %15 = arith.addf %13, %14 : vector<1x128xf32>
    %cst_8 = arith.constant 6.28318548 : f32
    %16 = vector.broadcast %cst_8 : f32 to vector<1x128xf32>
    %17 = arith.remf %15, %16 : vector<1x128xf32>
    %cst_9 = arith.constant 0.000000e+00 : f32
    %18 = vector.broadcast %cst_9 : f32 to vector<1x128xf32>
    %19 = arith.cmpf one, %17, %18 : vector<1x128xf32>
    %cst_10 = arith.constant 0.000000e+00 : f32
    %20 = vector.broadcast %cst_10 : f32 to vector<1x128xf32>
    %21 = arith.cmpf olt, %17, %20 : vector<1x128xf32>
    %cst_11 = arith.constant 0.000000e+00 : f32
    %22 = arith.cmpf olt, %cst_8, %cst_11 : f32
    %23 = vector.broadcast %22 : i1 to vector<1x128xi1>
    %24 = vector.broadcast %23 : vector<1x128xi1> to vector<1x128xi1>
    %25 = arith.xori %21, %24 : vector<1x128xi1>
    %26 = arith.andi %25, %19 : vector<1x128xi1>
    %27 = vector.broadcast %cst_8 : f32 to vector<1x128xf32>
    %28 = arith.addf %17, %27 : vector<1x128xf32>
    %29 = arith.select %26, %28, %17 : vector<1x128xi1>, vector<1x128xf32>
    %30 = vector.extract_strided_slice %29 {offsets = [0, 127], sizes = [1, 1], strides = [1, 1]} : vector<1x128xf32> to vector<1x1xf32>
    %c0_12 = arith.constant 0 : index
    %c0_13 = arith.constant 0 : index
    %c0_14 = arith.constant 0 : index
    %31 = vector.load %arg3[%c0_12, %c0_13, %c0_14] : memref<1x128x8xf32, #tpu.memory_space<vmem>>, vector<1x128x8xf32>
    %32 = vector.shape_cast %31 : vector<1x128x8xf32> to vector<128x8xf32>
    %33 = tpu.transpose %32, [1, 0] : vector<128x8xf32> -> vector<8x128xf32>
    %34 = vector.broadcast %4 : vector<1x128xf32> to vector<8x128xf32>
    %35 = vector.broadcast %11 : vector<8x1xf32> to vector<8x128xf32>
    %36 = arith.mulf %34, %35 : vector<8x128xf32>
    %cst_15 = arith.constant 4.000000e+03 : f32
    %37 = vector.broadcast %cst_15 : f32 to vector<8x128xf32>
    %38 = arith.cmpf olt, %36, %37 : vector<8x128xf32>
    %39 = arith.extui %38 : vector<8x128xi1> to vector<8x128xi32>
    %40 = arith.sitofp %39 : vector<8x128xi32> to vector<8x128xf32>
    %cst_16 = arith.constant 9.99999974E-5 : f32
    %41 = vector.broadcast %cst_16 : f32 to vector<8x128xf32>
    %42 = arith.addf %40, %41 : vector<8x128xf32>
    %43 = arith.mulf %33, %42 : vector<8x128xf32>
    %44 = vector.broadcast %29 : vector<1x128xf32> to vector<8x128xf32>
    %45 = vector.broadcast %11 : vector<8x1xf32> to vector<8x128xf32>
    %46 = arith.mulf %44, %45 : vector<8x128xf32>
    %47 = math.sin %46 : vector<8x128xf32>
    %48 = arith.mulf %47, %43 : vector<8x128xf32>
    %cst_17 = arith.constant dense<0.000000e+00> : vector<128xf32>
    %49 = vector.multi_reduction <add>, %48, %cst_17 [0] : vector<8x128xf32> to vector<128xf32>
    %50 = vector.shape_cast %49 : vector<128xf32> to vector<1x128xf32>
    %cst_18 = arith.constant 0.000000e+00 : f32
    %51 = vector.broadcast %cst_18 : f32 to vector<1x128xf32>
    %52 = arith.cmpf ogt, %4, %51 : vector<1x128xf32>
    %53 = arith.extui %52 : vector<1x128xi1> to vector<1x128xi32>
    %54 = arith.sitofp %53 : vector<1x128xi32> to vector<1x128xf32>
    %55 = arith.mulf %50, %54 : vector<1x128xf32>
    %c0_19 = arith.constant 0 : index
    %c0_20 = arith.constant 0 : index
    %c0_21 = arith.constant 0 : index
    %56 = vector.load %arg6[%c0_19, %c0_20, %c0_21] : memref<1x1x128xf32, #tpu.memory_space<vmem>>, vector<1x1x128xf32>
    %57 = vector.shape_cast %56 : vector<1x1x128xf32> to vector<1x128xf32>
    %58 = vector.shape_cast %55 : vector<1x128xf32> to vector<1x1x128xf32>
    tpu.vector_store %arg6[%c0_19, %c0_20, %c0_21], %58 {strides = array<i32>} : memref<1x1x128xf32, #tpu.memory_space<vmem>>, vector<1x1x128xf32>,
    %c0_22 = arith.constant 0 : index
    %c0_23 = arith.constant 0 : index
    %59 = vector.load %arg8[%c0_22, %c0_23] : memref<1x1xf32, #tpu.memory_space<vmem>>, vector<1x1xf32>
    tpu.vector_store %arg8[%c0_22, %c0_23], %30 {strides = array<i32>} : memref<1x1xf32, #tpu.memory_space<vmem>>, vector<1x1xf32>,
    %c0_i32_24 = arith.constant 0 : i32
    %60 = arith.cmpi eq, %arg1, %c0_i32_24 : i32
    %61 = arith.extui %60 : i1 to i32
    %c0_i32_25 = arith.constant 0 : i32
    %62 = arith.cmpi ne, %61, %c0_i32_25 : i32
    scf.if %62 {
      %c0_26 = arith.constant 0 : index
      %c0_27 = arith.constant 0 : index
      %c0_28 = arith.constant 0 : index
      %63 = vector.load %arg7[%c0_26, %c0_27, %c0_28] : memref<1x1x1xf32, #tpu.memory_space<vmem>>, vector<1x1x1xf32>
      %64 = vector.shape_cast %63 : vector<1x1x1xf32> to vector<1x1xf32>
      %65 = vector.shape_cast %30 : vector<1x1xf32> to vector<1x1x1xf32>
      tpu.vector_store %arg7[%c0_26, %c0_27, %c0_28], %65 {strides = array<i32>} : memref<1x1x1xf32, #tpu.memory_space<vmem>>, vector<1x1x1xf32>,
    } else {
    }
    return
  }
  func.func @transform_0(%arg0: i32, %arg1: i32) -> (i32, i32, i32) {
    %c0_i32 = arith.constant 0 : i32
    %c0_i32_0 = arith.constant 0 : i32
    return %arg0, %c0_i32, %arg1 : i32, i32, i32
  }
  func.func @transform_1(%arg0: i32, %arg1: i32) -> (i32, i32, i32) {
    %c0_i32 = arith.constant 0 : i32
    %c0_i32_0 = arith.constant 0 : i32
    return %arg0, %arg1, %c0_i32 : i32, i32, i32
  }
  func.func @transform_2(%arg0: i32, %arg1: i32) -> (i32, i32) {
    %c0_i32 = arith.constant 0 : i32
    %c0_i32_0 = arith.constant 0 : i32
    %c0_i32_1 = arith.constant 0 : i32
    return %c0_i32, %c0_i32_0 : i32, i32
  }
  func.func @transform_3(%arg0: i32, %arg1: i32) -> (i32, i32, i32) {
    %c0_i32 = arith.constant 0 : i32
    %c0_i32_0 = arith.constant 0 : i32
    %c0_i32_1 = arith.constant 0 : i32
    return %arg0, %c0_i32, %c0_i32_0 : i32, i32, i32
  }
  func.func @transform_4(%arg0: i32, %arg1: i32) -> (i32, i32, i32) {
    %c0_i32 = arith.constant 0 : i32
    %c0_i32_0 = arith.constant 0 : i32
    return %arg0, %c0_i32, %arg1 : i32, i32, i32
  }
  func.func @transform_5(%arg0: i32, %arg1: i32) -> (i32, i32, i32) {
    %c0_i32 = arith.constant 0 : i32
    %c0_i32_0 = arith.constant 0 : i32
    %c0_i32_1 = arith.constant 0 : i32
    return %arg0, %c0_i32, %c0_i32_0 : i32, i32, i32
  }
}

</mosaic_0001>

<bundles_post_ra>
// kernel: tpu_custom_call.1
= control target key start
LH: loop header
LB: loop body
LE: loop exit
PB: predicated region body
PF: predicated region fallthrough
CT: control target
= control target key end

     0   :  { %11 = vsyncpa [#allocation4], 0  ;;  %s1283_s0 = inlined_call_operand.vmem [shape: f32[2,1,128], index: 0, kind: input, shape index: {}]   ;;  %s1284_s1 = inlined_call_operand.vmem [shape: f32[2,64,8], index: 1, kind: input, shape index: {}]   ;;  %s1285_s2 = inlined_call_operand.vmem [shape: f32[128,128], index: 2, kind: input, shape index: {}]   ;;  %s1286_s3 = inlined_call_operand.vmem [shape: f32[2,1,1], index: 3, kind: input, shape index: {}]   ;;  %s1287_s4 = inlined_call_operand.hbm [shape: f32[2,1,128], index: 4, kind: output, shape index: {0}]   ;;  %s1288_s5 = inlined_call_operand.vmem [shape: f32[2,1,1], index: 5, kind: output, shape index: {1}]  }
   0x1   :  { %13 = vsyncpa [#allocation4 + $0x1], 0  ;;  %s1046_s18 = smov 0   ;;  %s1048_s19 = smov 0  }
   0x2   :  { %s1050_s20 = smov 0   ;;  %s1052_s21 = smov 0  }
   0x3   :  { %s1054_s22 = smov 0   ;;  %s1056_s23 = smov 0  }
   0x4 LB: > { %s756_s24 = sadd.s32 4294967295, %s1002_s23   ;;  %s757_s25 = sadd.s32 4294967294, %s1002_s23   ;;  %s1002_s23 = sphi %s1056_s23, %s19_s23   ;;  %s998_s22 = sphi %s1054_s22, %s1295_s22   ;;  %s994_s21 = sphi %s1052_s21, %s1294_s21   ;;  %s990_s20 = sphi %s1050_s20, %s1293_s20   ;;  %s986_s19 = sphi %s1048_s19, %s1292_s19   ;;  %s982_s18 = sphi %s1046_s18, %s1291_s18  }
   0x5   : > { %s31_s26 = sadd.s32 1, %s998_s22  ;;  %s143_s27 = sadd.s32 1, %s990_s20 }
   0x6   : > { %p33_p0 = scmp.ge.s32.totalorder %s31_s26, 2  ;;  %p153_p1 = scmp.ne.s32.totalorder %s990_s20, %s986_s19 }
   0x7   : > { %p154_p2 = scmp.eq.s32.totalorder %s756_s24, 1  ;;  %p159_p3 = scmp.ne.s32.totalorder %s986_s19, %s982_s18 }
   0x8   : > { %s1297_s26 = smov (%p33_p0, %s31_s26), 0  ;;  %p160_p5 = scmp.eq.s32.totalorder %s757_s25, 1 }
   0x9   : > { %p1086_p4 = por %p154_p2, %p153_p1  ;;  %s138_s29 = ssub.s32 %s998_s22, %s1297_s26 }
   0xa   : > { %p760_p6 = scmp.ge.s32.totalorder %s1002_s23, 1  ;;  %p141_p7 = scmp.eq.s32.totalorder %s138_s29, 0 }
   0xb   : > { %p1093_p8 = por %p160_p5, %p159_p3  ;;  %p239_p9 = scmp.lt.s32.totalorder %s1002_s23, 3 }
   0xc   : > { %s1099_s6 = scalar_select %p141_p7, %s990_s20, %s143_s27  }
   0xd   : > { %p240_p10 = pnand %p760_p6, %p239_p9 }
   0xe   : > { %v319_v0 = vld [vmem:[%s1285_s2] sm:$0xff] (!%p240_p10)  ;;  %v320_v1 = vld [vmem:[%s1285_s2 + $0x8] sm:$0xff] (!%p240_p10)  ;;  %v321_v2 = vld [vmem:[%s1285_s2 + $0x10] sm:$0xff] (!%p240_p10)  ;;  %p284_p11 = scmp.lt.s32.totalorder (!%p240_p10), %s994_s21, 1  ;;  %v1004_v3 = vmov (!%p240_p10), 0.0|0.0   ;;  %vm1005_vm0 = vmmov (!%p240_p10), 0   ;;  %v335_v47 = vlaneseq (!%p240_p10) }
   0xf   : > { %243 = sbr.rel (%p240_p10) target bundleno = 397 (0x18d), region = 36  ;;  %825 = vmatprep.subr.bf16.mxu0 (!%p240_p10), %v1004_v3  ;;  %v826_v4 = vpack.c.bf16 (!%p240_p10), %v320_v1, %v319_v0  ;;  %v322_v5 = vld [vmem:[%s1285_s2 + $0x18] sm:$0xff] (!%p240_p10)  ;;  %v1006_v6 = vmov (!%p240_p10), 0.0   ;;  %v1007_v7 = vmov (!%p240_p10), 0   ;;  %v323_v9 = vld [vmem:[%s1285_s2 + $0x20] sm:$0xff] (!%p240_p10)  ;;  %v324_v10 = vld [vmem:[%s1285_s2 + $0x28] sm:$0xff] (!%p240_p10) }
  0x10   : > { %822 = vmatprep.mubr.msk.f32.mxu0 (!%p240_p10), %vm1005_vm0, %v1006_v6  ;;  %919 = vset.pattern.permute.xlu0 (!%p240_p10), %v1007_v7  ;;  %v829_v8 = vpack.c.bf16 (!%p240_p10), %v322_v5, %v321_v2  ;;  %vm315_vm1 = vcmask (!%p240_p10), 0   ;;  %v832_v12 = vpack.c.bf16 (!%p240_p10), %v324_v10, %v323_v9  ;;  %v325_v13 = vld [vmem:[%s1285_s2 + $0x30] sm:$0xff] (!%p240_p10)  ;;  %v326_v14 = vld [vmem:[%s1285_s2 + $0x38] sm:$0xff] (!%p240_p10)  ;;  %v327_v16 = vld [vmem:[%s1285_s2 + $0x40] sm:$0xff] (!%p240_p10)  ;;  %v336_v48 = vshrl.u32 (!%p240_p10), %v335_v47, 7  ;;  %s277_s8 = sand.u32 (!%p240_p10), 1, %s986_s19  }
  0x11   : > { %827 = vmatpush3.bf16.msra.mxu0 (!%p240_p10), %v826_v4  ;;  %v835_v15 = vpack.c.bf16 (!%p240_p10), %v326_v14, %v325_v13  ;;  %v328_v17 = vld [vmem:[%s1285_s2 + $0x48] sm:$0xff] (!%p240_p10)  ;;  %v329_v20 = vld [vmem:[%s1285_s2 + $0x50] sm:$0xff] (!%p240_p10)  ;;  %v330_v21 = vld [vmem:[%s1285_s2 + $0x58] sm:$0xff] (!%p240_p10)  ;;  %s769_s9 = sshll.u32 (!%p240_p10), %s994_s21, 4  ;;  %s278_s10 = scalar_lea.vmem (!%p240_p10), [#allocation3], %s277_s8 }
  0x12   : > { %828 = vmatprep.subr.bf16.mxu0 (!%p240_p10), %v1004_v3  ;;  %v838_v19 = vpack.c.bf16 (!%p240_p10), %v328_v17, %v327_v16  ;;  %v841_v22 = vpack.c.bf16 (!%p240_p10), %v330_v21, %v329_v20  ;;  %v331_v23 = vld [vmem:[%s1285_s2 + $0x60] sm:$0xff] (!%p240_p10)  ;;  %v332_v24 = vld [vmem:[%s1285_s2 + $0x68] sm:$0xff] (!%p240_p10)  ;;  %v333_v26 = vld [vmem:[%s1285_s2 + $0x70] sm:$0xff] (!%p240_p10)  ;;  %v1188_v49 = vsub.s32 (!%p240_p10), 0, %v336_v48  ;;  %v1191_v63 = vadd.s32 (!%p240_p10), 1, %v336_v48  ;;  %s643_s11 = sshll.u32 (!%p240_p10), %s278_s10, 4  ;;  %s1230_s14 = scalar_lea.hbm (!%p240_p10), %s1287_s4, %s769_s9  ;;  %s1232_s11 = int_to_ptr.vmem [resolvable:$true] %s643_s11 }
  0x13   : > { %v844_v25 = vpack.c.bf16 (!%p240_p10), %v332_v24, %v331_v23  ;;  %v334_v27 = vld [vmem:[%s1285_s2 + $0x78] sm:$0xff] (!%p240_p10)  ;;  %v1010_v20 = vmov (!%p240_p10), 920167782   ;;  %v1011_v24 = vmov (!%p240_p10), 1326507024   ;;  %s627_s16 = scalar_lea.sflag (!%p240_p10), [#allocation4], %s277_s8 }
  0x14   : > { %v847_v28 = vpack.c.bf16 (!%p240_p10), %v334_v27, %v333_v26  ;;  %v338_v2 = vcvt.s32.f32 (!%p240_p10), %v1191_v63  ;;  %v1012_v26 = vmov (!%p240_p10), 683565275  }
  0x15   : > { %830 = vmatpush3.bf16.msra.mxu0 (!%p240_p10), %v829_v8 }
  0x16   : > { %s1116_s15 = scalar_select %p284_p11, %s994_s21, 1  ;;  %831 = vmatprep.subr.bf16.mxu0 %v1004_v3 }
  0x17   : > { %s1015_s21 = smov [#allocation3]  }
  0x18   : > { %s306_s7 = scalar_lea.vmem %s1286_s3, %s1116_s15  ;;  %s289_s17 = scalar_lea.vmem %s1283_s0, %s1116_s15 }
  0x19   : > { %v314_v11 = vld [vmem:[%s306_s7] sm:$0x1]  ;;  %833 = vmatpush3.bf16.msra.mxu0 %v832_v12  ;;  %s772_s24 = sshll.u32 %s1116_s15, 6  ;;  %s1008_s7 = smov 1  }
  0x1a   : > { %316 = vst.msk [vmem:[#allocation2] sm:$0x1] %vm315_vm1, %v314_v11  ;;  %834 = vmatprep.subr.bf16.mxu0 %v1004_v3  ;;  %v1163_v29 = vld [vmem:[%s289_s17] sm:$0x1]  ;;  %s1170_s29 = scalar_lea.vmem %s1284_s1, %s772_s24  ;;  %s924_s17 = scalar_lea.vmem %s1232_s11, 16 }
  0x1b   : > { %v318_v30 = vmul.f32 0.0007853982, %v1163_v29  ;;  %v435_v31 = vld [vmem:[%s1170_s29] sm:$0xff]  ;;  %v436_v32 = vld [vmem:[%s1170_s29 + $0x8] sm:$0xff]  ;;  %v437_v33 = vld [vmem:[%s1170_s29 + $0x10] sm:$0xff]  ;;  %p925_p12 = scmp.ne.s32.totalorder %s1232_s11, %s924_s17  ;;  %s928_s24 = sshll.u32 %s1015_s21, 4  ;;  %s929_s24 = int_to_ptr.vmem [resolvable:$false] %s928_s24 }
  0x1c   : > { %v438_v34 = vld [vmem:[%s1170_s29 + $0x18] sm:$0xff]  ;;  %v439_v35 = vld [vmem:[%s1170_s29 + $0x20] sm:$0xff]  ;;  %v440_v36 = vld [vmem:[%s1170_s29 + $0x28] sm:$0xff]  ;;  %s930_s25 = scalar_lea.vmem %s929_s24, 32  ;;  %p931_p1 = scmp.lt.s32.totalorder %s1232_s11, %s929_s24 }
  0x1d   : > { %836 = vmatpush3.bf16.msra.mxu0 %v835_v15  ;;  %v441_v37 = vld [vmem:[%s1170_s29 + $0x30] sm:$0xff]  ;;  %v442_v38 = vld [vmem:[%s1170_s29 + $0x38] sm:$0xff]  ;;  %v443_v39 = vld [vmem:[%s1170_s29 + $0x40] sm:$0xff]  ;;  %p926_p13 = pnand %p925_p12, %p1086_p4  ;;  %p932_p2 = scmp.lt.s32.totalorder %s930_s25, %s924_s17 }
  0x1e   : > { %837 = vmatprep.subr.bf16.mxu0 %v1004_v3  ;;  %v444_v40 = vld [vmem:[%s1170_s29 + $0x48] sm:$0xff]  ;;  %v445_v41 = vld [vmem:[%s1170_s29 + $0x50] sm:$0xff]  ;;  %v446_v42 = vld [vmem:[%s1170_s29 + $0x58] sm:$0xff] }
  0x1f   : > { %v447_v43 = vld [vmem:[%s1170_s29 + $0x60] sm:$0xff]  ;;  %v448_v44 = vld [vmem:[%s1170_s29 + $0x68] sm:$0xff]  ;;  %v449_v45 = vld [vmem:[%s1170_s29 + $0x70] sm:$0xff]  ;;  %p927_p0 = pneg %p926_p13  ;;  %p933_p3 = por %p932_p2, %p931_p1 }
  0x20   : > { %v450_v46 = vld [vmem:[%s1170_s29 + $0x78] sm:$0xff] }
  0x21   : > { %v339_v18 = vld [vmem:[#allocation2] sm:$0x1]  ;;  %839 = vmatpush3.bf16.msra.mxu0 %v838_v19  ;;  %p934_p5 = pnand %p933_p3, %p927_p0 }
  0x22   : > { %342 = vperm.xlu0 %919, %v339_v18   ;;  %840 = vmatprep.subr.bf16.mxu0 %v1004_v3  ;;  %v1009_v18 = vmov 2102212464  }
  0x25   : > { %842 = vmatpush3.bf16.msra.mxu0 %v841_v22 }
  0x26   : > { %843 = vmatprep.subr.bf16.mxu0 %v1004_v3 }
  0x29   : > { %845 = vmatpush3.bf16.msra.mxu0 %v844_v25 }
  0x2a   : > { %846 = vmatprep.subr.bf16.mxu0 %v1004_v3 }
  0x2d   : > { %848 = vmatpush3.bf16.msra.mxu0 %v847_v28  ;;  %v1013_v28 = vmov 2475754826  }
  0x30   : > { %823 = vmatmul.mubr.f32.vlgmr.msra.gmra.mrb[0].mxu0 %v318_v30 }
  0x40   : > { %451 = vxpose.xlu0.b32.start [1/16] (narrow) %v435_v31, 8 }
  0x44   : > { %452 = vxpose.xlu0.b32.cont [2/16] (narrow) %v436_v32, 8  ;;  %v1014_v32 = vmov 2131351028  }
  0x48   : > { %453 = vxpose.xlu0.b32.cont [3/16] (narrow) %v437_v33, 8 }
  0x4c   : > { %454 = vxpose.xlu0.b32.cont [4/16] (narrow) %v438_v34, 8 }
  0x50   : > { %455 = vxpose.xlu0.b32.cont [5/16] (narrow) %v439_v35, 8 }
  0x54   : > { %456 = vxpose.xlu0.b32.cont [6/16] (narrow) %v440_v36, 8 }
  0x58   : > { %457 = vxpose.xlu0.b32.cont [7/16] (narrow) %v441_v37, 8 }
  0x5c   : > { %458 = vxpose.xlu0.b32.cont [8/16] (narrow) %v442_v38, 8 }
  0x60   : > { %459 = vxpose.xlu0.b32.cont [9/16] (narrow) %v443_v39, 8 }
  0x64   : > { %460 = vxpose.xlu0.b32.cont [10/16] (narrow) %v444_v40, 8 }
  0x68   : > { %461 = vxpose.xlu0.b32.cont [11/16] (narrow) %v445_v41, 8 }
  0x6c   : > { %462 = vxpose.xlu0.b32.cont [12/16] (narrow) %v446_v42, 8 }
  0x70   : > { %463 = vxpose.xlu0.b32.cont [13/16] (narrow) %v447_v43, 8 }
  0x74   : > { %464 = vxpose.xlu0.b32.cont [14/16] (narrow) %v448_v44, 8 }
  0x78   : > { %465 = vxpose.xlu0.b32.cont [15/16] (narrow) %v449_v45, 8 }
  0x7c   : > { %466 = vxpose.xlu0.b32.end [16/16] (narrow) %v450_v46, 8 }
  0xa1   : > { %v343_v50 = vpop.permute.xlu0 %342 }
  0xa2   : > { %v348_v51 = vrot.slane %v343_v50, %v1188_v49 }
 0x103   : > { %v415_v52 = vpop.f32.mrb[0].mxu0 }
 0x104   : > { %v416_v53 = vadd.f32 %v415_v52, %v348_v51  ;;  %v824_v54 = vpop.f32.mrb[1].mxu0 }
 0x106   : > { %v419_v55 = vand.u32 2147483647, %v416_v53  ;;  %v428_v62 = vand.u32 2147483648, %v416_v53 }
 0x108   : > { %v421_v56 = vmul.f32 0.15915494, %v419_v55 }
 0x10a   : > { %v422_v57 = vfloor.f32 %v421_v56 }
 0x10c   : > { %v423_v58 = vmul.f32 6.2831855, %v422_v57 }
 0x10e   : > { %v424_v59 = vsub.f32 %v419_v55, %v423_v58 }
 0x110   : > { %vm425_vm2 = vcmp.eq.f32.partialorder %v424_v59, 6.2831855 }
 0x111   : > { %v426_v60 = vsel %vm425_vm2, 0.0, %v424_v59 }
 0x112   : > { %v427_v61 = vand.u32 2147483647, %v426_v60 }
 0x114   : > { %v429_v0 = vor.u32 %v428_v62, %v427_v61 }
 0x116   : > { %vm430_vm3 = vcmp.ne.f32.partialorder %v429_v0, 0.0  ;;  %vm431_vm4 = vcmp.lt.f32.partialorder %v429_v0, 0.0  ;;  %v433_v1 = vadd.f32 6.2831855, %v429_v0 }
 0x117   : > { %vm432_vm5 = vmand %vm431_vm4, %vm430_vm3 }
 0x118   : > { %v434_v3 = vsel %vm432_vm5, %v433_v1, %v429_v0  ;;  %vm611_vm5 = vcmp.gt.f32.partialorder %v1163_v29, 0.0 }
 0x119   : > { %617 = vrot.lane.b32.xlu1 %v434_v3, %s1008_s7  ;;  %v498_v4 = vrot.slane %v434_v3, %v1188_v49 }
 0x11b   : > { %v1197_v5 = vmul.f32 %v498_v4, %v338_v2 }
 0x11d   : > { %v503_v7 = vand.u32 2139095040, %v1197_v5  ;;  %v500_v8 = vand.u32 2147483647, %v1197_v5  ;;  %vm502_vm13 = vcmp.lt.s32.totalorder %v1197_v5, 0  ;;  %vm592_vm4 = vweird.f32 %v1197_v5 }
 0x11f   : > { %v504_v9 = vshrl.u32 %v503_v7, 23  ;;  %v507_v11 = vand.u32 8388607, %v500_v8  ;;  %vm501_vm14 = vcmp.le.f32.partialorder %v500_v8, 0.7853982 }
 0x121   : > { %v764_v10 = vadd.s32 4294967169, %v504_v9  ;;  %v508_v14 = vor.u32 8388608, %v507_v11 }
 0x123   : > { %v510_v12 = vadd.s32 1, %v764_v10  ;;  %v548_v22 = vshll.u32 %v508_v14, 8 }
 0x125   : > { %vm511_vm6 = vcmp.gt.s32.totalorder %v510_v12, 0 }
 0x126   : > { %v512_v13 = vsel %vm511_vm6, %v510_v12, 0 }
 0x127   : > { %v514_v15 = vand.u32 31, %v512_v13  ;;  %v513_v16 = vshrl.u32 %v512_v13, 5 }
 0x129   : > { %v515_v17 = vsub.s32 32, %v514_v15  ;;  %v526_v19 = vshll.u32 %v1009_v18, %v514_v15  ;;  %v529_v21 = vshll.u32 %v1010_v20, %v514_v15  ;;  %v517_v27 = vshll.u32 %v1012_v26, %v514_v15 }
 0x12a   : > { %v520_v31 = vshll.u32 %v1013_v28, %v514_v15  ;;  %v523_v34 = vshll.u32 %v1014_v32, %v514_v15  ;;  %vm535_vm7 = vcmp.lt.s32.totalorder %v513_v16, 4  ;;  %vm532_vm8 = vcmp.lt.s32.totalorder %v513_v16, 1 }
 0x12b   : > { %v527_v23 = vshrl.u32 %v1010_v20, %v515_v17  ;;  %v530_v25 = vshrl.u32 %v1011_v24, %v515_v17  ;;  %v518_v30 = vshrl.u32 %v1013_v28, %v515_v17  ;;  %v521_v33 = vshrl.u32 %v1014_v32, %v515_v17 }
 0x12c   : > { %v524_v35 = vshrl.u32 %v1009_v18, %v515_v17  ;;  %v516_v39 = vshrl.u32 %v1012_v26, %v515_v17  ;;  %vm533_vm9 = vcmp.lt.s32.totalorder %v513_v16, 2  ;;  %vm534_vm10 = vcmp.lt.s32.totalorder %v513_v16, 3 }
 0x12d   : > { %v528_v36 = vor.u32 %v527_v23, %v526_v19  ;;  %v531_v37 = vor.u32 %v530_v25, %v529_v21  ;;  %v519_v38 = vor.u32 %v518_v30, %v517_v27  ;;  %v522_v40 = vor.u32 %v521_v33, %v520_v31 }
 0x12e   : > { %v525_v41 = vor.u32 %v524_v35, %v523_v34  ;;  %v487_v26 = vrot.slane %v1163_v29, %v1188_v49 }
 0x12f   : > { %v541_v42 = vsel %vm535_vm7, %v528_v36, 920167782  ;;  %v545_v43 = vsel %vm535_vm7, %v531_v37, 1326507024  ;;  %v540_v45 = vsel %vm532_vm8, %v519_v38, %v522_v40  ;;  %v536_v48 = vsel %vm532_vm8, %v516_v39, %v519_v38  ;;  %v467_v38 = vpop.trf.xlu0 }
 0x130   : > { %v537_v44 = vsel %vm535_vm7, %v525_v41, 2102212464  ;;  %v542_v46 = vsel %vm534_vm10, %v525_v41, %v541_v42  ;;  %v544_v47 = vsel %vm532_vm8, %v522_v40, %v525_v41  ;;  %v546_v52 = vsel %vm534_vm10, %v528_v36, %v545_v43 }
 0x131   : > { %v538_v50 = vsel %vm534_vm10, %v522_v40, %v537_v44  ;;  %v543_v51 = vsel %vm533_vm9, %v540_v45, %v542_v46  ;;  %v547_v53 = vsel %vm533_vm9, %v544_v47, %v546_v52  ;;  %v489_v31 = vmul.f32 %v487_v26, %v338_v2 }
 0x132   : > { %v1203_v54 = vmul.u32.u64.low %v548_v22, %v543_v51  ;;  %v1204_v55 = vmul.u32.u64.high %v548_v22, %v543_v51, %v1203_v54  ;;  %v1206_v56 = vmul.u32.u64.low %v548_v22, %v547_v53  ;;  %v1207_v57 = vmul.u32.u64.high %v548_v22, %v547_v53, %v1206_v56 }
 0x133   : > { %v539_v58 = vsel %vm533_vm9, %v536_v48, %v538_v50  ;;  %vm490_vm15 = vcmp.lt.f32.partialorder %v489_v31, 4000.0  ;;  %v768_v51 = vsel %vm611_vm5, 1.0, %v1006_v6 }
 0x134   : > { %v558_v59 = vadd.s32 1, %v1204_v55  ;;  %v555_v60 = vmul.u32 %v548_v22, %v539_v58  ;;  %vm557_vm11 = vc.u32 %v1207_v57, %v1203_v54  ;;  %v556_v13 = vadd.s32 %v1203_v54, %v1207_v57 }
 0x135   : > { %v763_v49 = vsel %vm490_vm15, 1.0, %v1006_v6 }
 0x136   : > { %v559_v61 = vsel %vm557_vm11, %v558_v59, %v1204_v55  ;;  %v493_v36 = vadd.f32 0.0001, %v763_v49 }
 0x137   : > { %v560_v62 = vadd.s32 %v559_v61, %v555_v60 }
 0x138   : > { %v494_v63 = vmul.f32 %v493_v36, %v467_v38 }
 0x139   : > { %v561_v0 = vadd.s32 536870912, %v560_v62 }
 0x13b   : > { %v562_v1 = vshrl.u32 %v561_v0, 30 }
 0x13d   : > { %v563_v3 = vshll.u32 %v562_v1, 30  ;;  %v586_v25 = vsub.s32 4, %v562_v1 }
 0x13f   : > { %v564_v4 = vsub.s32 %v560_v62, %v563_v3  ;;  %v587_v30 = vsel %vm502_vm13, %v586_v25, %v562_v1 }
 0x140   : > { %v589_v33 = vsel %vm501_vm14, 0, %v587_v30 }
 0x141   : > { %v566_v7 = vsub.s32 0, %v564_v4  ;;  %v593_v34 = vadd.s32 3, %v589_v33 }
 0x143   : > { %v765_v9 = vmin.u32 %v566_v7, %v564_v4  ;;  %v594_v35 = vand.u32 3, %v593_v34 }
 0x145   : > { %v568_v10 = vclz %v765_v9  ;;  %vm599_vm0 = vcmp.eq.s32.totalorder %v594_v35, 2  ;;  %vm596_vm2 = vcmp.eq.s32.totalorder %v594_v35, 0  ;;  %vm595_vm3 = vcmp.lt.s32.totalorder %v594_v35, 2 }
 0x147   : > { %v766_v11 = vadd.s32 4294967294, %v568_v10 }
 0x149   : > { %vm767_vm12 = vcmp.lt.s32.totalorder %v766_v11, 0 }
 0x14a   : > { %v571_v12 = vsel %vm767_vm12, 0, %v766_v11 }
 0x14b   : > { %v572_v14 = vsub.s32 32, %v571_v12  ;;  %v576_v15 = vsub.s32 4294967266, %v571_v12  ;;  %v573_v16 = vshll.u32 %v564_v4, %v571_v12 }
 0x14d   : > { %v574_v17 = vshrl.u32 %v556_v13, %v572_v14  ;;  %v577_v18 = vadd.s32 127, %v576_v15 }
 0x14f   : > { %v575_v19 = vor.u32 %v574_v17, %v573_v16  ;;  %v578_v20 = vshll.u32 %v577_v18, 23 }
 0x151   : > { %v579_v21 = vor.u32 4788187, %v578_v20  ;;  %v582_v23 = vcvt.s32.f32 %v575_v19 }
 0x153   : > { %v580_v22 = vand.u32 2147483647, %v579_v21 }
 0x155   : > { %v583_v24 = vmul.f32 %v582_v23, %v580_v22 }
 0x157   : > { %v584_v27 = vxor.u32 2147483648, %v583_v24 }
 0x159   : > { %v585_v28 = vsel %vm502_vm13, %v584_v27, %v583_v24 }
 0x15a   : > { %v588_v32 = vsel %vm501_vm14, %v1197_v5, %v585_v28 }
 0x15b   : > { %920 = vcosq.f32 %v588_v32 }
 0x15c   : > { %922 = vsinq.f32 %v588_v32 }
 0x165   : > { %v921_v37 = vpop.eup %920 }
 0x166   : > { %v923_v39 = vpop.eup %922  ;;  %v600_v8 = vxor.u32 2147483648, %v921_v37 }
 0x167   : > { %v597_v40 = vxor.u32 2147483648, %v923_v39 }
 0x168   : > { %v601_v2 = vsel %vm599_vm0, %v600_v8, %v923_v39 }
 0x169   : > { %v598_v41 = vsel %vm596_vm2, %v921_v37, %v597_v40 }
 0x16a   : > { %v602_v42 = vsel %vm595_vm3, %v598_v41, %v601_v2 }
 0x16b   : > { %v603_v43 = vsel %vm592_vm4, nan, %v602_v42 }
 0x16c   : > { %v604_v44 = vmul.f32 %v603_v43, %v494_v63 }
 0x16e   : > { %v605_v45 = vrot.slane %v604_v44, 4 }
 0x170   : > { %v606_v46 = vadd.f32 %v605_v45, %v604_v44 }
 0x172   : > { %v607_v47 = vrot.slane %v606_v46, 2 }
 0x174   : > { %v608_v48 = vadd.f32 %v607_v47, %v606_v46 }
 0x176   : > { %v609_v50 = vrot.slane %v608_v48, 1 }
 0x178   : > { %v610_v52 = vadd.f32 %v609_v50, %v608_v48 }
 0x17a   : > { %v614_v53 = vmul.f32 %v768_v51, %v610_v52 }
 0x17c   : > { %615 = vst [vmem:[%s278_s10] sm:$0x1] %v614_v53 }
 0x17d   : > { %937 = shalt.err (!%p934_p5)
}
 0x17e   : > { %s938_s27 = scalar_lea.hbm %s1230_s14, 16  ;;  %s942_s8 = scalar_lea.hbm %s1287_s4, 32 }
 0x17f   : > { %p939_p6 = scmp.ne.s32.totalorder %s1230_s14, %s938_s27  ;;  %p943_p10 = scmp.lt.u32.totalorder %s1230_s14, %s1287_s4 }
 0x180   : > { %p944_p11 = scmp.lt.u32.totalorder %s942_s8, %s938_s27  ;;  %p946_p13 = scmp.lt.u32.totalorder %s938_s27, %s1230_s14 }
 0x181   : > { %p940_p7 = pnand %p939_p6, %p1086_p4 }
 0x182   : > { %p945_p12 = por %p944_p11, %p943_p10 }
 0x183   : > { %p941_p9 = pneg %p940_p7 }
 0x184   : > { %p947_p0 = por %p946_p13, %p945_p12 }
 0x186   : > { %p948_p1 = pnand %p947_p0, %p941_p9 }
 0x188   : > { %951 = shalt.err (!%p948_p1)
}
 0x189   : > { %853 = dma.vmem_to_hbm [thread:$0]  (%p1086_p4), %s1232_s11, 16, %s1230_s14, %s627_s16  }
 0x18a   : > { %s309_s17 = scalar_lea.vmem %s1288_s5, %s1116_s15 }
 0x18b   : > { %v618_v6 = vpop.permute.xlu1 %617 }
 0x18c   : > { %621 = vst.msk [vmem:[#allocation2] sm:$0x1] %vm315_vm1, %v618_v6  ;;  %625 = vst.msk [vmem:[%s309_s17] sm:$0x1] %vm315_vm1, %v618_v6 }
 0x18d PF: > { %p859_p2 = scmp.ge.s32.totalorder %s1002_s23, 2  ;;  %s658_s21 = sand.u32 1, %s982_s18  }
 0x18e   : > { %s659_s28 = scalar_lea.sflag [#allocation4], %s658_s21 }
 0x18f   : > { %p856_p3 = pnand %p859_p2, %p1093_p8 }
 0x191   : > { %977 = dma.done.wait (!%p856_p3), %s659_s28, 16  }
 0x192   : > { %979 = vsyncadd (!%p856_p3), %s659_s28, 4294967280  ;;  %s19_s23 = sadd.s32 1, %s1002_s23   ;;  %s1291_s18 = smov %s986_s19 }
 0x193   : > { %p16_p4 = scmp.ge.s32.totalorder %s19_s23, 4   ;;  %s1292_s19 = smov %s990_s20 }
 0x194   : > { %s1293_s20 = smov %s1099_s6  ;;  %s1294_s21 = smov %s998_s22 }
 0x195   : > { %s1295_s22 = smov %s1297_s26  ;;  %18 = sbr.rel (!%p16_p4) target bundleno = 4 (0x4), region = 97 }
 0x19c   :  { %669 = vsyncpa [#allocation4], 1 }
 0x19d   :  { %671 = vsyncpa [#allocation4 + $0x1], 1 }

</bundles_post_ra>
